<compile_context>
chip_gen: v7x
topology: tpu7x:2x2x1
jax: 0.10.0
libtpu: 0.0.40
codegen_flags: <defaults>
</compile_context>

<pallas_src>
import jax
import jax.numpy as jnp
import numpy as np
from jax import lax
from jax.experimental import pallas as pl
from jax.experimental.pallas import tpu as pltpu


def classifier_kernel(x_ref, emb_ref, w1_ref, b1_ref, w2_ref, b2_ref, out_ref):
    x = x_ref[...]                                   # (Bp, T) int32 token ids
    Bp, T = x.shape
    V = emb_ref.shape[0]

    # --- Encoder: mean over T of (token_emb[x] + pos_emb[x]) -----------------
    # Histogram over the vocab from 2-D compares only (no (B,T,V) one-hot):
    #   hist[b, v] = #{t : x[b, t] == v}
    # T is small & static -> static-sliced Python unroll is fine (switch to
    # lax.fori_loop(unroll=True) or the gather path if T grows beyond ~a dozen).
    vocab_iota = lax.broadcasted_iota(jnp.int32, (Bp, V), 1)      # (Bp, V)
    hist = jnp.zeros((Bp, V), jnp.float32)
    for t in range(T):
        hist = hist + (x[:, t:t + 1] == vocab_iota).astype(jnp.float32)
    hist_b = hist.astype(jnp.bfloat16)               # counts <= T, exact in bf16

    # mean of gathered (tok+pos) rows == hist @ ((tok + pos) / T)
    # -> one MXU matmul; the table is pre-combined and pre-scaled in the wrapper.
    enc = jnp.dot(hist_b, emb_ref[...], preferred_element_type=jnp.float32)  # (Bp, E)

    # --- MLP head: relu(Linear) -> softmax(Linear) ---------------------------
    h = jnp.dot(enc.astype(jnp.bfloat16), w1_ref[...],
                preferred_element_type=jnp.float32) + b1_ref[...]
    h = jnp.maximum(h, 0.0)                          # (Bp, Hp)

    logits = jnp.dot(h.astype(jnp.bfloat16), w2_ref[...],
                     preferred_element_type=jnp.float32) + b2_ref[...]       # (Bp, Cp)
    # Padded classes carry bias -1e9 -> exp underflows to 0, so the 128-lane
    # softmax equals softmax over the real 3 classes.
    m = jnp.max(logits, axis=1, keepdims=True)
    e = jnp.exp(logits - m)
    denom = jnp.sum(e, axis=1, keepdims=True)
    out_ref[...] = e * pl.reciprocal(denom, approx=False)


def _round_up(n, m):
    return ((n + m - 1) // m) * m


def prepare_params(tok_table, pos_table, w1, b1, w2, b2, T):
    """One-time parameter padding / fusing / casting (NOT on the per-call path)."""
    V, E = tok_table.shape
    H = w1.shape[1]
    n_cls = w2.shape[1]

    Hp = _round_up(H, 128)                 # lane multiple for the hidden dim
    Cp = _round_up(max(n_cls, 128), 128)   # lane-dense output, sliced to n_cls later

    # Fused, pre-scaled embedding table: mean over T folded into the table.
    emb_b = ((tok_table + pos_table) * jnp.float32(1.0 / T)).astype(jnp.bfloat16)

    w1_p = jnp.zeros((E, Hp), jnp.float32).at[:, :H].set(w1).astype(jnp.bfloat16)
    b1_p = jnp.zeros((1, Hp), jnp.float32).at[:, :H].set(b1)
    w2_p = jnp.zeros((Hp, Cp), jnp.float32).at[:H, :n_cls].set(w2).astype(jnp.bfloat16)
    b2_p = jnp.full((1, Cp), -1e9, jnp.float32).at[:, :n_cls].set(b2)

    params = dict(emb=emb_b, w1=w1_p, b1=b1_p, w2=w2_p, b2=b2_p)
    # Materialize once so per-call forwards do not re-pay the padding/cast ops.
    return jax.tree_util.tree_map(jax.block_until_ready,
                                  jax.tree_util.tree_map(jnp.asarray, params)), n_cls


def _vmem_bytes(Bp, T, V, E, Hp, Cp):
    total = (Bp * T * 4            # x (int32)
             + V * E * 2           # combined table (bf16)
             + E * Hp * 2 + Hp * 4  # w1 + b1
             + Hp * Cp * 2 + Cp * 4  # w2 + b2
             + Bp * Cp * 4)        # output
    return max(2 * total, 1 << 20)  # 2x headroom, >= 1 MiB


def classifier_forward(x, params, n_cls):
    """Per-call path: pad x, run the kernel, slice the lane-dense output."""
    B, T = x.shape
    V, E = params["emb"].shape
    Hp = params["w1"].shape[1]
    Cp = params["w2"].shape[1]
    Bp = _round_up(max(B, 16), 16)         # 16: bf16 MXU LHS packs 16 rows / vreg

    @jax.jit
    def _run(x, emb, w1, b1, w2, b2):
        x_p = jnp.zeros((Bp, T), jnp.int32).at[:B].set(x)
        vmem = pl.BlockSpec(memory_space=pltpu.MemorySpace.VMEM)
        out_p = pl.pallas_call(
            classifier_kernel,
            out_shape=jax.ShapeDtypeStruct((Bp, Cp), jnp.float32),
            in_specs=[vmem] * 6,
            out_specs=vmem,
            compiler_params=pltpu.CompilerParams(
                vmem_limit_bytes=_vmem_bytes(Bp, T, V, E, Hp, Cp)),
        )(x_p, emb, w1, b1, w2, b2)
        return out_p[:B, :n_cls]

    return _run(x, params["emb"], params["w1"], params["b1"],
                params["w2"], params["b2"])


def reference_forward(x, tok_table, pos_table, w1, b1, w2, b2):
    emb = tok_table[x] + pos_table[x]              # (B, T, E)
    enc = jnp.mean(emb, axis=1)                    # (B, E)
    h = jax.nn.relu(enc @ w1 + b1)                 # (B, H)
    return jax.nn.softmax(h @ w2 + b2, axis=1)     # (B, 3)


if __name__ == "__main__":
    # Small shapes consistent with the module.
    B, T = 2, 8
    vocab_size = 32
    embd = 64
    hidden = 100
    n_classes = 3

    key = jax.random.PRNGKey(0)
    k_tok, k_pos, k_w1, k_b1, k_w2, k_b2, k_x = jax.random.split(key, 7)

    # Deterministic synthetic parameters (shapes match nn.Embedding / nn.Linear,
    # with Linear weights stored as (in, out) so y = x @ W + b).
    tok_table = jax.random.normal(k_tok, (vocab_size, embd), jnp.float32) * 0.02
    pos_table = jax.random.normal(k_pos, (vocab_size, embd), jnp.float32) * 0.02
    w1 = jax.random.normal(k_w1, (embd, hidden), jnp.float32) * 0.1
    b1 = jax.random.normal(k_b1, (1, hidden), jnp.float32) * 0.1
    w2 = jax.random.normal(k_w2, (hidden, n_classes), jnp.float32) * 0.1
    b2 = jax.random.normal(k_b2, (1, n_classes), jnp.float32) * 0.1

    x = jax.random.randint(k_x, (B, T), 0, vocab_size, jnp.int32)

    # One-time parameter preparation (padding / fusing / bf16 cast) — off the
    # per-call path.
    params, n_cls = prepare_params(tok_table, pos_table, w1, b1, w2, b2, T)

    out = classifier_forward(x, params, n_cls)
    out = jax.block_until_ready(out)

    ref = reference_forward(x, tok_table, pos_table, w1, b1, w2, b2)
    # bf16 MXU operands (and the 1/T scale folded into the bf16 table) vs. the
    # pure-f32 reference -> loosened tolerance.
    np.testing.assert_allclose(np.asarray(out), np.asarray(ref), rtol=1e-2, atol=1e-2)

    print("KERNEL_OK")
</pallas_src>

<mosaic_0001>
module attributes {stable_mosaic.version = 11 : i64} {
  func.func @classifier_kernel(%arg0: memref<16x8xi32, #tpu.memory_space<vmem>>, %arg1: memref<32x64xbf16, #tpu.memory_space<vmem>>, %arg2: memref<64x128xbf16, #tpu.memory_space<vmem>>, %arg3: memref<1x128xf32, #tpu.memory_space<vmem>>, %arg4: memref<128x128xbf16, #tpu.memory_space<vmem>>, %arg5: memref<1x128xf32, #tpu.memory_space<vmem>>, %arg6: memref<16x128xf32, #tpu.memory_space<vmem>>) attributes {dimension_semantics = [], scalar_prefetch = 0 : i64, scratch_operands = 0 : i64, tpu.core_type = #tpu.core_type<tc>} {
    %c0 = arith.constant 0 : index
    %c0_0 = arith.constant 0 : index
    %0 = vector.load %arg0[%c0, %c0_0] : memref<16x8xi32, #tpu.memory_space<vmem>>, vector<16x8xi32>
    %1 = tpu.iota {dimensions = array<i32: 1>} : vector<16x32xi32>
    %cst = arith.constant 0.000000e+00 : f32
    %2 = vector.broadcast %cst : f32 to vector<16x32xf32>
    %3 = vector.extract_strided_slice %0 {offsets = [0, 0], sizes = [16, 1], strides = [1, 1]} : vector<16x8xi32> to vector<16x1xi32>
    %4 = vector.broadcast %3 : vector<16x1xi32> to vector<16x32xi32>
    %5 = arith.cmpi eq, %4, %1 : vector<16x32xi32>
    %6 = arith.extui %5 : vector<16x32xi1> to vector<16x32xi32>
    %7 = arith.sitofp %6 : vector<16x32xi32> to vector<16x32xf32>
    %8 = arith.addf %2, %7 : vector<16x32xf32>
    %9 = vector.extract_strided_slice %0 {offsets = [0, 1], sizes = [16, 1], strides = [1, 1]} : vector<16x8xi32> to vector<16x1xi32>
    %10 = vector.broadcast %9 : vector<16x1xi32> to vector<16x32xi32>
    %11 = arith.cmpi eq, %10, %1 : vector<16x32xi32>
    %12 = arith.extui %11 : vector<16x32xi1> to vector<16x32xi32>
    %13 = arith.sitofp %12 : vector<16x32xi32> to vector<16x32xf32>
    %14 = arith.addf %8, %13 : vector<16x32xf32>
    %15 = vector.extract_strided_slice %0 {offsets = [0, 2], sizes = [16, 1], strides = [1, 1]} : vector<16x8xi32> to vector<16x1xi32>
    %16 = vector.broadcast %15 : vector<16x1xi32> to vector<16x32xi32>
    %17 = arith.cmpi eq, %16, %1 : vector<16x32xi32>
    %18 = arith.extui %17 : vector<16x32xi1> to vector<16x32xi32>
    %19 = arith.sitofp %18 : vector<16x32xi32> to vector<16x32xf32>
    %20 = arith.addf %14, %19 : vector<16x32xf32>
    %21 = vector.extract_strided_slice %0 {offsets = [0, 3], sizes = [16, 1], strides = [1, 1]} : vector<16x8xi32> to vector<16x1xi32>
    %22 = vector.broadcast %21 : vector<16x1xi32> to vector<16x32xi32>
    %23 = arith.cmpi eq, %22, %1 : vector<16x32xi32>
    %24 = arith.extui %23 : vector<16x32xi1> to vector<16x32xi32>
    %25 = arith.sitofp %24 : vector<16x32xi32> to vector<16x32xf32>
    %26 = arith.addf %20, %25 : vector<16x32xf32>
    %27 = vector.extract_strided_slice %0 {offsets = [0, 4], sizes = [16, 1], strides = [1, 1]} : vector<16x8xi32> to vector<16x1xi32>
    %28 = vector.broadcast %27 : vector<16x1xi32> to vector<16x32xi32>
    %29 = arith.cmpi eq, %28, %1 : vector<16x32xi32>
    %30 = arith.extui %29 : vector<16x32xi1> to vector<16x32xi32>
    %31 = arith.sitofp %30 : vector<16x32xi32> to vector<16x32xf32>
    %32 = arith.addf %26, %31 : vector<16x32xf32>
    %33 = vector.extract_strided_slice %0 {offsets = [0, 5], sizes = [16, 1], strides = [1, 1]} : vector<16x8xi32> to vector<16x1xi32>
    %34 = vector.broadcast %33 : vector<16x1xi32> to vector<16x32xi32>
    %35 = arith.cmpi eq, %34, %1 : vector<16x32xi32>
    %36 = arith.extui %35 : vector<16x32xi1> to vector<16x32xi32>
    %37 = arith.sitofp %36 : vector<16x32xi32> to vector<16x32xf32>
    %38 = arith.addf %32, %37 : vector<16x32xf32>
    %39 = vector.extract_strided_slice %0 {offsets = [0, 6], sizes = [16, 1], strides = [1, 1]} : vector<16x8xi32> to vector<16x1xi32>
    %40 = vector.broadcast %39 : vector<16x1xi32> to vector<16x32xi32>
    %41 = arith.cmpi eq, %40, %1 : vector<16x32xi32>
    %42 = arith.extui %41 : vector<16x32xi1> to vector<16x32xi32>
    %43 = arith.sitofp %42 : vector<16x32xi32> to vector<16x32xf32>
    %44 = arith.addf %38, %43 : vector<16x32xf32>
    %45 = vector.extract_strided_slice %0 {offsets = [0, 7], sizes = [16, 1], strides = [1, 1]} : vector<16x8xi32> to vector<16x1xi32>
    %46 = vector.broadcast %45 : vector<16x1xi32> to vector<16x32xi32>
    %47 = arith.cmpi eq, %46, %1 : vector<16x32xi32>
    %48 = arith.extui %47 : vector<16x32xi1> to vector<16x32xi32>
    %49 = arith.sitofp %48 : vector<16x32xi32> to vector<16x32xf32>
    %50 = arith.addf %44, %49 : vector<16x32xf32>
    %51 = arith.truncf %50 : vector<16x32xf32> to vector<16x32xbf16>
    %c0_1 = arith.constant 0 : index
    %c0_2 = arith.constant 0 : index
    %52 = vector.load %arg1[%c0_1, %c0_2] : memref<32x64xbf16, #tpu.memory_space<vmem>>, vector<32x64xbf16>
    %cst_3 = arith.constant dense<0.000000e+00> : vector<16x64xf32>
    %53 = tpu.matmul %51, %52, %cst_3 {dimension_numbers = #tpu.dot_dimension_numbers<[1], [0], [0], [1], [0, 0, 1, 1], [], []>} : vector<16x32xbf16>, vector<32x64xbf16>, vector<16x64xf32> -> vector<16x64xf32>
    %54 = arith.truncf %53 : vector<16x64xf32> to vector<16x64xbf16>
    %c0_4 = arith.constant 0 : index
    %c0_5 = arith.constant 0 : index
    %55 = vector.load %arg2[%c0_4, %c0_5] : memref<64x128xbf16, #tpu.memory_space<vmem>>, vector<64x128xbf16>
    %cst_6 = arith.constant dense<0.000000e+00> : vector<16x128xf32>
    %56 = tpu.matmul %54, %55, %cst_6 {dimension_numbers = #tpu.dot_dimension_numbers<[1], [0], [0], [1], [0, 0, 1, 1], [], []>} : vector<16x64xbf16>, vector<64x128xbf16>, vector<16x128xf32> -> vector<16x128xf32>
    %c0_7 = arith.constant 0 : index
    %c0_8 = arith.constant 0 : index
    %57 = vector.load %arg3[%c0_7, %c0_8] : memref<1x128xf32, #tpu.memory_space<vmem>>, vector<1x128xf32>
    %58 = vector.broadcast %57 : vector<1x128xf32> to vector<16x128xf32>
    %59 = arith.addf %56, %58 : vector<16x128xf32>
    %cst_9 = arith.constant 0.000000e+00 : f32
    %60 = vector.broadcast %cst_9 : f32 to vector<16x128xf32>
    %61 = arith.maximumf %59, %60 : vector<16x128xf32>
    %62 = arith.truncf %61 : vector<16x128xf32> to vector<16x128xbf16>
    %c0_10 = arith.constant 0 : index
    %c0_11 = arith.constant 0 : index
    %63 = vector.load %arg4[%c0_10, %c0_11] : memref<128x128xbf16, #tpu.memory_space<vmem>>, vector<128x128xbf16>
    %cst_12 = arith.constant dense<0.000000e+00> : vector<16x128xf32>
    %64 = tpu.matmul %62, %63, %cst_12 {dimension_numbers = #tpu.dot_dimension_numbers<[1], [0], [0], [1], [0, 0, 1, 1], [], []>} : vector<16x128xbf16>, vector<128x128xbf16>, vector<16x128xf32> -> vector<16x128xf32>
    %c0_13 = arith.constant 0 : index
    %c0_14 = arith.constant 0 : index
    %65 = vector.load %arg5[%c0_13, %c0_14] : memref<1x128xf32, #tpu.memory_space<vmem>>, vector<1x128xf32>
    %66 = vector.broadcast %65 : vector<1x128xf32> to vector<16x128xf32>
    %67 = arith.addf %64, %66 : vector<16x128xf32>
    %cst_15 = arith.constant dense<0xFF800000> : vector<16xf32>
    %68 = vector.multi_reduction <maximumf>, %67, %cst_15 [1] : vector<16x128xf32> to vector<16xf32>
    %69 = vector.shape_cast %68 : vector<16xf32> to vector<16x1xf32>
    %70 = vector.broadcast %69 : vector<16x1xf32> to vector<16x128xf32>
    %71 = arith.subf %67, %70 : vector<16x128xf32>
    %72 = math.exp %71 : vector<16x128xf32>
    %cst_16 = arith.constant dense<0.000000e+00> : vector<16xf32>
    %73 = vector.multi_reduction <add>, %72, %cst_16 [1] : vector<16x128xf32> to vector<16xf32>
    %74 = vector.shape_cast %73 : vector<16xf32> to vector<16x1xf32>
    %75 = tpu.reciprocal %74 : vector<16x1xf32> -> vector<16x1xf32>
    %76 = vector.broadcast %75 : vector<16x1xf32> to vector<16x128xf32>
    %77 = arith.mulf %72, %76 : vector<16x128xf32>
    %c0_17 = arith.constant 0 : index
    %c0_18 = arith.constant 0 : index
    %78 = vector.load %arg6[%c0_17, %c0_18] : memref<16x128xf32, #tpu.memory_space<vmem>>, vector<16x128xf32>
    tpu.vector_store %arg6[%c0_17, %c0_18], %77 {strides = array<i32>} : memref<16x128xf32, #tpu.memory_space<vmem>>, vector<16x128xf32>,
    return
  }
}

</mosaic_0001>

<bundles_post_ra>
// kernel: _run.1
= control target key start
LH: loop header
LB: loop body
LE: loop exit
PB: predicated region body
PF: predicated region fallthrough
CT: control target
= control target key end

     0   :  { %11 = vsyncpa [#allocation3], 0  ;;  %s777_s0 = inlined_call_operand.vmem [shape: s32[16,8], index: 0, kind: input, shape index: {}]   ;;  %s778_s1 = inlined_call_operand.vmem [shape: bf16[32,64], index: 1, kind: input, shape index: {}]   ;;  %s779_s2 = inlined_call_operand.hbm [shape: bf16[64,128], index: 2, kind: input, shape index: {}]   ;;  %s780_s3 = inlined_call_operand.vmem [shape: f32[1,128], index: 3, kind: input, shape index: {}]   ;;  %s781_s4 = inlined_call_operand.hbm [shape: bf16[128,128], index: 4, kind: input, shape index: {}]   ;;  %s782_s5 = inlined_call_operand.vmem [shape: f32[1,128], index: 5, kind: input, shape index: {}]   ;;  %s783_s6 = inlined_call_operand.vmem [shape: f32[16,128], index: 6, kind: output, shape index: {}]  }
   0x1   :  { %12 = vsyncpa [#allocation5], 0  ;;  %s644_s21 = smov [#allocation2]   ;;  %s596_s25 = scalar_lea.hbm %s779_s2, 512 }
   0x2   :  { %s22_s22 = sshll.u32 %s644_s21, 4  ;;  %p597_p0 = scmp.ne.s32.totalorder %s779_s2, %s596_s25  ;;  %s23_s22 = int_to_ptr.vmem [resolvable:$true] %s22_s22 }
   0x3   :  { %p600_p1 = scmp.lt.u32.totalorder %s596_s25, %s779_s2 }
   0x5   :  { %p602_p2 = pnand %p600_p1, %p597_p0 }
   0x7   :  { %605 = shalt.err (!%p602_p2)
}
   0x8   :  { %s606_s30 = scalar_lea.vmem %s23_s22, 512  ;;  %p611_p4 = scmp.lt.s32.totalorder %s23_s22, %s23_s22 }
   0x9   :  { %p607_p3 = scmp.ne.s32.totalorder %s23_s22, %s606_s30  ;;  %p612_p5 = scmp.lt.s32.totalorder %s606_s30, %s606_s30 }
   0xb   :  { %p613_p6 = por %p612_p5, %p611_p4 }
   0xd   :  { %p614_p7 = pnand %p613_p6, %p607_p3 }
   0xf   :  { %617 = shalt.err (!%p614_p7)
}
  0x10   :  { %s645_s7 = smov 64   ;;  %s646_s8 = smov 4  }
  0x11   :  { %28 = dma.hbm_to_vmem [thread:$0]  %s779_s2, 512, %s23_s22, [#allocation3], %s645_s7, %s645_s7, %s646_s8  }
  0x12   :  { %s647_s11 = smov [#allocation4]   ;;  %s618_s15 = scalar_lea.hbm %s781_s4, 1024 }
  0x13   :  { %s36_s12 = sshll.u32 %s647_s11, 4  ;;  %p619_p8 = scmp.ne.s32.totalorder %s781_s4, %s618_s15  ;;  %s37_s12 = int_to_ptr.vmem [resolvable:$true] %s36_s12 }
  0x14   :  { %p622_p9 = scmp.lt.u32.totalorder %s618_s15, %s781_s4 }
  0x16   :  { %p624_p10 = pnand %p622_p9, %p619_p8 }
  0x18   :  { %627 = shalt.err (!%p624_p10)
}
  0x19   :  { %s628_s20 = scalar_lea.vmem %s37_s12, 1024  ;;  %p633_p12 = scmp.lt.s32.totalorder %s37_s12, %s37_s12 }
  0x1a   :  { %p629_p11 = scmp.ne.s32.totalorder %s37_s12, %s628_s20  ;;  %p634_p13 = scmp.lt.s32.totalorder %s628_s20, %s628_s20 }
  0x1c   :  { %p635_p0 = por %p634_p13, %p633_p12 }
  0x1e   :  { %p636_p1 = pnand %p635_p0, %p629_p11 }
  0x20   :  { %639 = shalt.err (!%p636_p1)
}
  0x21   :  { %42 = dma.hbm_to_vmem [thread:$0]  %s781_s4, 1024, %s37_s12, [#allocation5], %s645_s7, %s645_s7, %s646_s8  }
  0x22   :  { %640 = dma.done.wait [#allocation3], 512  }
  0x23   :  { %641 = vsyncadd [#allocation3], 4294966784 }
  0x24   :  { %642 = dma.done.wait [#allocation5], 1024  }
  0x25   :  { %643 = vsyncadd [#allocation5], 4294966272  ;;  %v648_v0 = vmov 1   ;;  %v649_v1 = vmov 0   ;;  %v650_v2 = vmov 0.0   ;;  %v52_v3 = vld [vmem:[%s777_s0] sm:$0xff]  ;;  %v54_v19 = vlaneseq }
  0x26   :  { %562 = vset.pattern.permute.xlu1 %v648_v0  ;;  %561 = vset.pattern.permute.xlu0 %v649_v1  ;;  %v53_v4 = vld [vmem:[%s777_s0 + $0x8] sm:$0xff]  ;;  %v651_v5 = vmov 2   ;;  %v652_v6 = vmov 3   ;;  %v653_v7 = vmov 4   ;;  %v654_v8 = vmov 5   ;;  %v574_v11 = vld [vmem:[%s778_s1] sm:$0xff]  }
  0x27   :  { %507 = vmatprep.subr.bf16.mxu1 %v650_v2  ;;  %527 = vmatprep.subr.bf16.mxu0 %v650_v2  ;;  %v655_v9 = vmov 6   ;;  %v656_v10 = vmov 7   ;;  %v575_v12 = vld [vmem:[%s778_s1 + $0x8] sm:$0xff]   ;;  %vm657_vm0 = vmmov 0   ;;  %v55_v22 = vand.u32 127, %v54_v19  ;;  %v576_v61 = vld [vmem:[#allocation2] sm:$0xff]  }
  0x28   :  { %71 = vperm.xlu1 %562, %v52_v3   ;;  %57 = vperm.xlu0 %561, %v52_v3   ;;  %v577_v63 = vld [vmem:[#allocation2 + $0x8] sm:$0xff]   ;;  %v578_v0 = vld [vmem:[#allocation2 + $0x10] sm:$0xff]   ;;  %v579_v1 = vld [vmem:[#allocation2 + $0x18] sm:$0xff]  }
  0x29   :  { %508 = vmatpush3.bf16.msra.mxu1 %v574_v11  ;;  %511 = vmatprep.mubr.msk.bf16.mxu1 %vm657_vm0, %v650_v2 }
  0x2a   :  { %509 = vmatprep.subr.bf16.mxu1 %v650_v2  ;;  %543 = vmatprep.mubr.msk.bf16.mxu0 %vm657_vm0, %v650_v2 }
  0x2c   :  { %74 = vperm.xlu1 %562, %v53_v4   ;;  %60 = vperm.xlu0 %561, %v53_v4  }
  0x2d   :  { %510 = vmatpush3.bf16.msra.mxu1 %v575_v12 }
  0x2e   :  { %515 = vmatprep.subr.bf16.mxu1 %v650_v2 }
  0x30   :  { %564 = vset.pattern.permute.xlu1 %v651_v5  ;;  %563 = vset.pattern.permute.xlu0 %v651_v5  ;;  %v582_v5 = vld [vmem:[#allocation4 + $0x10] sm:$0xff]  }
  0x31   :  { %88 = vperm.xlu1 %564, %v53_v4   ;;  %85 = vperm.xlu0 %563, %v52_v3  }
  0x35   :  { %565 = vset.pattern.permute.xlu1 %v652_v6  ;;  %566 = vset.pattern.permute.xlu0 %v652_v6  ;;  %v583_v6 = vld [vmem:[#allocation4 + $0x18] sm:$0xff]  }
  0x36   :  { %99 = vperm.xlu1 %565, %v52_v3   ;;  %102 = vperm.xlu0 %566, %v53_v4  }
  0x3a   :  { %567 = vset.pattern.permute.xlu1 %v653_v7  ;;  %568 = vset.pattern.permute.xlu0 %v654_v8  ;;  %v584_v7 = vld [vmem:[#allocation4 + $0x20] sm:$0xff]  }
  0x3b   :  { %113 = vperm.xlu1 %567, %v52_v3   ;;  %127 = vperm.xlu0 %568, %v52_v3  }
  0x3f   :  { %116 = vperm.xlu1 %567, %v53_v4   ;;  %571 = vset.pattern.permute.xlu0 %v655_v9 }
  0x40   :  { %144 = vperm.xlu0 %571, %v53_v4  }
  0x43   :  { %569 = vset.pattern.permute.xlu1 %v654_v8  ;;  %v585_v8 = vld [vmem:[#allocation4 + $0x28] sm:$0xff]  }
  0x44   :  { %130 = vperm.xlu1 %569, %v53_v4   ;;  %573 = vset.pattern.permute.xlu0 %v656_v10 }
  0x48   :  { %570 = vset.pattern.permute.xlu1 %v655_v9 }
  0x49   :  { %141 = vperm.xlu1 %570, %v52_v3  }
  0x4d   :  { %572 = vset.pattern.permute.xlu1 %v656_v10 }
  0x4e   :  { %155 = vperm.xlu1 %572, %v52_v3   ;;  %v580_v3 = vld [vmem:[#allocation4] sm:$0xff]  }
  0x4f   :  { %528 = vmatpush3.bf16.msra.mxu0 %v580_v3 }
  0x50   :  { %529 = vmatprep.subr.bf16.mxu0 %v650_v2 }
  0x52   :  { %158 = vperm.xlu1 %572, %v53_v4   ;;  %v581_v4 = vld [vmem:[#allocation4 + $0x8] sm:$0xff]  }
  0x53   :  { %530 = vmatpush3.bf16.msra.mxu0 %v581_v4 }
  0x54   :  { %531 = vmatprep.subr.bf16.mxu0 %v650_v2 }
  0x57   :  { %532 = vmatpush3.bf16.msra.mxu0 %v582_v5 }
  0x58   :  { %533 = vmatprep.subr.bf16.mxu0 %v650_v2 }
  0x5b   :  { %534 = vmatpush3.bf16.msra.mxu0 %v583_v6 }
  0x5c   :  { %535 = vmatprep.subr.bf16.mxu0 %v650_v2 }
  0x5f   :  { %536 = vmatpush3.bf16.msra.mxu0 %v584_v7 }
  0x60   :  { %537 = vmatprep.subr.bf16.mxu0 %v650_v2 }
  0x63   :  { %538 = vmatpush3.bf16.msra.mxu0 %v585_v8 }
  0x64   :  { %539 = vmatprep.subr.bf16.mxu0 %v650_v2 }
  0xa7   :  { %v72_v13 = vpop.permute.xlu1 %71  ;;  %v58_v15 = vpop.permute.xlu0 %57 }
  0xa8   :  { %vm76_vm1 = vcmp.eq.s32.totalorder %v72_v13, %v55_v22  ;;  %vm62_vm2 = vcmp.eq.s32.totalorder %v58_v15, %v55_v22  ;;  %v587_v15 = vld [vmem:[#allocation4 + $0x38] sm:$0xff]  }
  0xa9   :  { %v458_v25 = vsel %vm76_vm1, 1.0, %v650_v2  ;;  %v456_v26 = vsel %vm62_vm2, 1.0, %v650_v2  ;;  %vm185_vm2 = vcmask 261120  }
  0xaa   :  { %v82_v33 = vadd.f32 %v458_v25, %v456_v26 }
  0xab   :  { %v75_v14 = vpop.permute.xlu1 %74  ;;  %v61_v17 = vpop.permute.xlu0 %60 }
  0xac   :  { %vm77_vm3 = vcmp.eq.s32.totalorder %v75_v14, %v55_v22  ;;  %vm63_vm4 = vcmp.eq.s32.totalorder %v61_v17, %v55_v22  ;;  %v586_v14 = vld [vmem:[#allocation4 + $0x30] sm:$0xff]  }
  0xad   :  { %v459_v27 = vsel %vm77_vm3, 1.0, %v650_v2  ;;  %v457_v28 = vsel %vm63_vm4, 1.0, %v650_v2  ;;  %540 = vmatpush3.bf16.msra.mxu0 %v586_v14 }
  0xae   :  { %v83_v34 = vadd.f32 %v459_v27, %v457_v28  ;;  %541 = vmatprep.subr.bf16.mxu0 %v650_v2 }
  0xb0   :  { %v89_v16 = vpop.permute.xlu1 %88  ;;  %v86_v21 = vpop.permute.xlu0 %85 }
  0xb1   :  { %vm91_vm5 = vcmp.eq.s32.totalorder %v89_v16, %v55_v22  ;;  %vm90_vm6 = vcmp.eq.s32.totalorder %v86_v21, %v55_v22  ;;  %542 = vmatpush3.bf16.msra.mxu0 %v587_v15  ;;  %v475_v16 = vld [vmem:[%s780_s3] ss:$0 sm:$0xff] }
  0xb2   :  { %v461_v30 = vsel %vm91_vm5, 1.0, %v650_v2  ;;  %v460_v31 = vsel %vm90_vm6, 1.0, %v650_v2 }
  0xb3   :  { %v97_v37 = vadd.f32 %v461_v30, %v83_v34  ;;  %v96_v38 = vadd.f32 %v460_v31, %v82_v33 }
  0xb5   :  { %v100_v18 = vpop.permute.xlu1 %99  ;;  %v103_v24 = vpop.permute.xlu0 %102 }
  0xb6   :  { %vm104_vm7 = vcmp.eq.s32.totalorder %v100_v18, %v55_v22  ;;  %vm105_vm8 = vcmp.eq.s32.totalorder %v103_v24, %v55_v22 }
  0xb7   :  { %v462_v35 = vsel %vm104_vm7, 1.0, %v650_v2  ;;  %v463_v36 = vsel %vm105_vm8, 1.0, %v650_v2 }
  0xb8   :  { %v110_v43 = vadd.f32 %v462_v35, %v96_v38  ;;  %v111_v44 = vadd.f32 %v463_v36, %v97_v37 }
  0xba   :  { %v114_v20 = vpop.permute.xlu1 %113  ;;  %v128_v32 = vpop.permute.xlu0 %127 }
  0xbb   :  { %vm118_vm9 = vcmp.eq.s32.totalorder %v114_v20, %v55_v22  ;;  %vm132_vm12 = vcmp.eq.s32.totalorder %v128_v32, %v55_v22 }
  0xbc   :  { %v464_v40 = vsel %vm118_vm9, 1.0, %v650_v2  ;;  %v466_v48 = vsel %vm132_vm12, 1.0, %v650_v2 }
  0xbd   :  { %v124_v46 = vadd.f32 %v464_v40, %v110_v43 }
  0xbe   :  { %v117_v23 = vpop.permute.xlu1 %116 }
  0xbf   :  { %vm119_vm10 = vcmp.eq.s32.totalorder %v117_v23, %v55_v22  ;;  %v145_v42 = vpop.permute.xlu0 %144  ;;  %v138_v53 = vadd.f32 %v466_v48, %v124_v46 }
  0xc0   :  { %v465_v41 = vsel %vm119_vm10, 1.0, %v650_v2  ;;  %vm147_vm13 = vcmp.eq.s32.totalorder %v145_v42, %v55_v22 }
  0xc1   :  { %v125_v47 = vadd.f32 %v465_v41, %v111_v44  ;;  %v469_v51 = vsel %vm147_vm13, 1.0, %v650_v2 }
  0xc3   :  { %v131_v29 = vpop.permute.xlu1 %130 }
  0xc4   :  { %vm133_vm11 = vcmp.eq.s32.totalorder %v131_v29, %v55_v22 }
  0xc5   :  { %v467_v45 = vsel %vm133_vm11, 1.0, %v650_v2 }
  0xc6   :  { %v139_v50 = vadd.f32 %v467_v45, %v125_v47 }
  0xc8   :  { %v142_v39 = vpop.permute.xlu1 %141  ;;  %v153_v56 = vadd.f32 %v469_v51, %v139_v50 }
  0xc9   :  { %vm146_vm14 = vcmp.eq.s32.totalorder %v142_v39, %v55_v22 }
  0xca   :  { %v468_v52 = vsel %vm146_vm14, 1.0, %v650_v2 }
  0xcb   :  { %v152_v57 = vadd.f32 %v468_v52, %v138_v53 }
  0xcd   :  { %v156_v49 = vpop.permute.xlu1 %155 }
  0xce   :  { %vm160_vm15 = vcmp.eq.s32.totalorder %v156_v49, %v55_v22 }
  0xcf   :  { %v470_v54 = vsel %vm160_vm15, 1.0, %v650_v2 }
  0xd0   :  { %v166_v59 = vadd.f32 %v470_v54, %v152_v57 }
  0xd1   :  { %v159_v55 = vpop.permute.xlu1 %158 }
  0xd2   :  { %vm161_vm1 = vcmp.eq.s32.totalorder %v159_v55, %v55_v22 }
  0xd3   :  { %v471_v58 = vsel %vm161_vm1, 1.0, %v650_v2 }
  0xd4   :  { %v167_v60 = vadd.f32 %v471_v58, %v153_v56 }
  0xd6   :  { %v168_v62 = vpack.c.bf16 %v167_v60, %v166_v59 }
  0xd8   :  { %512 = vmatmul.mubr.msk.bf16.vlgmr.msra.gmra.mrb[0].mxu1 %vm185_vm2, %v168_v62 }
  0xd9   :  { %516 = vmatpush3.bf16.msra.mxu1 %v576_v61  ;;  %523 = vmatprep.mubr.msk.bf16.mxu1 %vm657_vm0, %v650_v2  ;;  %vm270_vm0 = vcmask 523264  }
  0xda   :  { %517 = vmatprep.subr.bf16.mxu1 %v650_v2 }
  0xdd   :  { %518 = vmatpush3.bf16.msra.mxu1 %v577_v63 }
  0xde   :  { %519 = vmatprep.subr.bf16.mxu1 %v650_v2 }
  0xe1   :  { %520 = vmatpush3.bf16.msra.mxu1 %v578_v0 }
  0xe2   :  { %521 = vmatprep.subr.bf16.mxu1 %v650_v2  ;;  %v481_v2 = vld [vmem:[%s782_s5] ss:$0 sm:$0xff] }
  0xe5   :  { %522 = vmatpush3.bf16.msra.mxu1 %v579_v1 }
 0x1ab   :  { %v223_v9 = vpop.f32.mrb[0].mxu1 }
 0x1ac   :  { %v513_v10 = vpop.f32.mrb[1].mxu1 }
 0x1ad   :  { %v226_v11 = vpop.f32.mrb[2].mxu1 }
 0x1ae   :  { %v230_v12 = vpack.c.bf16 %v226_v11, %v223_v9  ;;  %v514_v13 = vpop.f32.mrb[3].mxu1 }
 0x1b0   :  { %524 = vmatmul.mubr.msk.bf16.vlgmr.msra.gmra.mrb[4].mxu1 %vm270_vm0, %v230_v12 }
 0x283   :  { %v308_v17 = vpop.f32.mrb[4].mxu1 }
 0x284   :  { %v309_v18 = vadd.f32 %v475_v16, %v308_v17  ;;  %v525_v19 = vpop.f32.mrb[5].mxu1 }
 0x285   :  { %v311_v20 = vpop.f32.mrb[6].mxu1 }
 0x286   :  { %v312_v21 = vadd.f32 %v475_v16, %v311_v20  ;;  %v526_v22 = vpop.f32.mrb[7].mxu1  ;;  %v315_v23 = vmax.f32 %v309_v18, 0.0 }
 0x288   :  { %v316_v24 = vmax.f32 %v312_v21, 0.0 }
 0x28a   :  { %v317_v25 = vpack.c.bf16 %v316_v24, %v315_v23 }
 0x28c   :  { %544 = vmatmul.mubr.bf16.vlgmr.msra.gmra.mrb[0].mxu0 %v317_v25 }
 0x35f   :  { %v423_v26 = vpop.f32.mrb[0].mxu0 }
 0x360   :  { %v424_v27 = vadd.f32 %v481_v2, %v423_v26  ;;  %v545_v28 = vpop.f32.mrb[1].mxu0 }
 0x361   :  { %v426_v29 = vpop.f32.mrb[2].mxu0 }
 0x362   :  { %v427_v30 = vadd.f32 %v481_v2, %v426_v29  ;;  %430 = vmax.xlane.f32.xlu0 %v424_v27  ;;  %v546_v31 = vpop.f32.mrb[3].mxu0 }
 0x364   :  { %432 = vmax.xlane.f32.xlu1 %v427_v30 }
 0x3ef   :  { %v431_v32 = vpop.xlane.xlu0 %430 }
 0x3f0   :  { %v434_v33 = vsub.f32 %v424_v27, %v431_v32 }
 0x3f1   :  { %v433_v34 = vpop.xlane.xlu1 %432 }
 0x3f2   :  { %v436_v35 = vmul.f32 1.442695, %v434_v33  ;;  %v435_v36 = vsub.f32 %v427_v30, %v433_v34 }
 0x3f4   :  { %588 = vpow2.f32 %v436_v35  ;;  %v438_v37 = vmul.f32 1.442695, %v435_v36 }
 0x3f6   :  { %590 = vpow2.f32 %v438_v37 }
 0x3fe   :  { %v589_v38 = vpop.eup %588 }
 0x3ff   :  { %440 = vadd.xlane.f32.xlu0 %v589_v38 }
 0x400   :  { %v591_v39 = vpop.eup %590 }
 0x403   :  { %442 = vadd.xlane.f32.xlu0 %v591_v39 }
 0x48c   :  { %v441_v40 = vpop.xlane.xlu0 %440 }
 0x48d   :  { %592 = vrcp.f32 %v441_v40 }
 0x490   :  { %v443_v41 = vpop.xlane.xlu0 %442 }
 0x491   :  { %594 = vrcp.f32 %v443_v41 }
 0x497   :  { %v593_v42 = vpop.eup %592 }
 0x498   :  { %v446_v43 = vmul.f32 %v593_v42, %v589_v38 }
 0x49a   :  { %448 = vst [vmem:[%s783_s6] sm:$0xff] %v446_v43 }
 0x49b   :  { %v595_v44 = vpop.eup %594 }
 0x49c   :  { %v447_v45 = vmul.f32 %v595_v44, %v591_v39 }
 0x49e   :  { %449 = vst [vmem:[%s783_s6 + $0x8] sm:$0xff] %v447_v45 }
 0x49f   :  { %454 = vsyncpa [#allocation3], 1 }
 0x4a0   :  { %455 = vsyncpa [#allocation5], 1 }

</bundles_post_ra>
